<compile_context>
chip_gen: v7x
topology: tpu7x:2x2x1
jax: 0.10.0
libtpu: 0.0.40
codegen_flags: <defaults>
</compile_context>

<pallas_src>
import jax
import jax.numpy as jnp
from jax.experimental import pallas as pl
from jax.experimental.pallas import tpu as pltpu


def _round_up(n, m):
    return ((n + m - 1) // m) * m


def perceptron_kernel(x_ref, w1_ref, b1_ref, w2_ref, b2_ref, o_ref):
    # x:  (8, TILE_B)   batch on the lane axis (dense vld)
    # w1: (10, 8)       PyTorch layout, used directly as the matmul LHS
    # b1: (10, 1)       broadcast along lanes
    # w2: (10, 1)       column vector for the VPU/XLU second layer
    # b2: (1, 1)        scalar in SMEM
    # o:  (1, TILE_B)   lane-dense output (dense vst)
    x = x_ref[...]

    # Layer 1 on the MXU: (10, 8) @ (8, TILE_B) -> (10, TILE_B)
    h = jnp.dot(w1_ref[...], x, preferred_element_type=jnp.float32) + b1_ref[...]
    h = jnp.tanh(h)

    # Layer 2 (10 -> 1): broadcast multiply (VPU) + sublane reduce (XLU);
    # a 10x1 matmul would waste MXU push/pop latency for <1% utilization.
    y = jnp.sum(h * w2_ref[...], axis=0, keepdims=True) + b2_ref[0, 0]

    o_ref[...] = y.astype(o_ref.dtype)


def perceptron_forward(x, w1, b1, w2, b2, *, max_tile_b=8192):
    """x: (B, 8) float32 (PyTorch convention).  Returns (B, 1) float32.

    Note: for tiny B (latency regime) plain XLA would be just as fast; the
    tiling below targets the throughput (large-B) regime but is correct for
    any B via lane padding.
    """
    B = x.shape[0]

    # Lane-dense tile size: multiple of 128, capped so double-buffered
    # tiles stay far below the scoped VMEM budget on all generations
    # (v7x 64 MiB physical included): 2 * 8 * TILE_B * 4B <= 512 KiB.
    tile_b = min(max_tile_b, _round_up(B, 128))
    b_pad = _round_up(B, tile_b)

    # Wrapper-side layout plumbing (cheap, outside the kernel).
    x_t = jnp.zeros((8, b_pad), jnp.float32).at[:, :B].set(x.T)
    b1_c = b1.reshape(10, 1).astype(jnp.float32)
    w2_c = w2.reshape(1, 10).T.astype(jnp.float32)   # (10, 1)
    b2_c = b2.reshape(1, 1).astype(jnp.float32)

    grid = (b_pad // tile_b,)

    y_t = pl.pallas_call(
        perceptron_kernel,
        out_shape=jax.ShapeDtypeStruct((1, b_pad), jnp.float32),
        grid_spec=pltpu.PrefetchScalarGridSpec(
            num_scalar_prefetch=0,
            grid=grid,
            in_specs=[
                # Batch-tiled input, batch on the lane axis.
                pl.BlockSpec((8, tile_b), lambda i: (0, i)),
                # Weights / biases: constant index_map -> VMEM-resident.
                pl.BlockSpec((10, 8), lambda i: (0, 0)),
                pl.BlockSpec((10, 1), lambda i: (0, 0)),
                pl.BlockSpec((10, 1), lambda i: (0, 0)),
                # Scalar bias in SMEM.
                pl.BlockSpec(memory_space=pltpu.MemorySpace.SMEM),
            ],
            out_specs=pl.BlockSpec((1, tile_b), lambda i: (0, i)),
        ),
        compiler_params=pltpu.CompilerParams(
            # Batch tiles are independent -> shard across TCs on v7x.
            dimension_semantics=("parallel",),
        ),
    )(x_t, w1.astype(jnp.float32), b1_c, w2_c, b2_c)

    # Back to the PyTorch (B, 1) convention; drop lane padding.
    return y_t[0, :B].reshape(B, 1)


def init_params(key):
    # Deterministic init mimicking nn.Linear defaults:
    # U(-1/sqrt(fan_in), 1/sqrt(fan_in)) for both weight and bias.
    # Stored in the PyTorch layout: W is (out_features, in_features).
    k1, k2, k3, k4 = jax.random.split(key, 4)
    bound1 = 1.0 / jnp.sqrt(8.0)
    bound2 = 1.0 / jnp.sqrt(10.0)
    w1 = jax.random.uniform(k1, (10, 8), jnp.float32, -bound1, bound1)
    b1 = jax.random.uniform(k2, (10,), jnp.float32, -bound1, bound1)
    w2 = jax.random.uniform(k3, (1, 10), jnp.float32, -bound2, bound2)
    b2 = jax.random.uniform(k4, (1,), jnp.float32, -bound2, bound2)
    return w1, b1, w2, b2


def reference_forward(x, w1, b1, w2, b2):
    h = jnp.tanh(x @ w1.T + b1)
    return h @ w2.T + b2


if __name__ == "__main__":
    key = jax.random.PRNGKey(0)
    kx, kp = jax.random.split(key)
    B = 8
    x = jax.random.normal(kx, (B, 8), jnp.float32)
    w1, b1, w2, b2 = init_params(kp)

    out = perceptron_forward(x, w1, b1, w2, b2)
    out = jax.block_until_ready(out)

    ref = reference_forward(x, w1, b1, w2, b2)
    assert out.shape == (B, 1)
    assert jnp.allclose(out, ref, atol=1e-5, rtol=1e-5)

    # Also exercise a larger, non-multiple-of-tile batch to cover tiling/padding.
    B2 = 1000
    x2 = jax.random.normal(jax.random.PRNGKey(1), (B2, 8), jnp.float32)
    out2 = jax.block_until_ready(perceptron_forward(x2, w1, b1, w2, b2))
    ref2 = reference_forward(x2, w1, b1, w2, b2)
    assert out2.shape == (B2, 1)
    assert jnp.allclose(out2, ref2, atol=1e-5, rtol=1e-5)

    print("KERNEL_OK")
</pallas_src>

<mosaic_0001>
module attributes {stable_mosaic.version = 11 : i64} {
  func.func @perceptron_kernel(%arg0: i32, %arg1: memref<8x128xf32, #tpu.memory_space<vmem>>, %arg2: memref<10x8xf32, #tpu.memory_space<vmem>>, %arg3: memref<10x1xf32, #tpu.memory_space<vmem>>, %arg4: memref<10x1xf32, #tpu.memory_space<vmem>>, %arg5: memref<1x1xf32, #tpu.memory_space<smem>>, %arg6: memref<1x128xf32, #tpu.memory_space<vmem>>) attributes {dimension_semantics = [#tpu.dimension_semantics<parallel>], iteration_bounds = array<i64: 1>, scalar_prefetch = 0 : i64, scratch_operands = 0 : i64, tpu.core_type = #tpu.core_type<tc>, window_params = [{transform_indices = @transform_0, window_bounds = array<i64: 8, 128>}, {pipeline_mode = #tpu.pipeline_mode<synchronous>, transform_indices = @transform_1, window_bounds = array<i64: 10, 8>}, {pipeline_mode = #tpu.pipeline_mode<synchronous>, transform_indices = @transform_2, window_bounds = array<i64: 10, 1>}, {pipeline_mode = #tpu.pipeline_mode<synchronous>, transform_indices = @transform_3, window_bounds = array<i64: 10, 1>}, {transform_indices = @transform_4, window_bounds = array<i64: 1, 1>}, {transform_indices = @transform_5, window_bounds = array<i64: 1, 128>}]} {
    %c0 = arith.constant 0 : index
    %c0_0 = arith.constant 0 : index
    %0 = vector.load %arg1[%c0, %c0_0] : memref<8x128xf32, #tpu.memory_space<vmem>>, vector<8x128xf32>
    %c0_1 = arith.constant 0 : index
    %c0_2 = arith.constant 0 : index
    %1 = vector.load %arg2[%c0_1, %c0_2] : memref<10x8xf32, #tpu.memory_space<vmem>>, vector<10x8xf32>
    %cst = arith.constant dense<0.000000e+00> : vector<10x128xf32>
    %2 = tpu.matmul %1, %0, %cst {dimension_numbers = #tpu.dot_dimension_numbers<[1], [0], [0], [1], [0, 0, 1, 1], [], []>} : vector<10x8xf32>, vector<8x128xf32>, vector<10x128xf32> -> vector<10x128xf32>
    %c0_3 = arith.constant 0 : index
    %c0_4 = arith.constant 0 : index
    %3 = vector.load %arg3[%c0_3, %c0_4] : memref<10x1xf32, #tpu.memory_space<vmem>>, vector<10x1xf32>
    %4 = vector.broadcast %3 : vector<10x1xf32> to vector<10x128xf32>
    %5 = arith.addf %2, %4 : vector<10x128xf32>
    %6 = math.tanh %5 : vector<10x128xf32>
    %c0_5 = arith.constant 0 : index
    %c0_6 = arith.constant 0 : index
    %7 = vector.load %arg4[%c0_5, %c0_6] : memref<10x1xf32, #tpu.memory_space<vmem>>, vector<10x1xf32>
    %8 = vector.broadcast %7 : vector<10x1xf32> to vector<10x128xf32>
    %9 = arith.mulf %6, %8 : vector<10x128xf32>
    %cst_7 = arith.constant dense<0.000000e+00> : vector<128xf32>
    %10 = vector.multi_reduction <add>, %9, %cst_7 [0] : vector<10x128xf32> to vector<128xf32>
    %11 = vector.shape_cast %10 : vector<128xf32> to vector<1x128xf32>
    %c0_8 = arith.constant 0 : index
    %c0_9 = arith.constant 0 : index
    %12 = memref.load %arg5[%c0_8, %c0_9] : memref<1x1xf32, #tpu.memory_space<smem>>
    %13 = vector.broadcast %12 : f32 to vector<1x128xf32>
    %14 = arith.addf %11, %13 : vector<1x128xf32>
    %c0_10 = arith.constant 0 : index
    %c0_11 = arith.constant 0 : index
    %15 = vector.load %arg6[%c0_10, %c0_11] : memref<1x128xf32, #tpu.memory_space<vmem>>, vector<1x128xf32>
    tpu.vector_store %arg6[%c0_10, %c0_11], %14 {strides = array<i32>} : memref<1x128xf32, #tpu.memory_space<vmem>>, vector<1x128xf32>,
    return
  }
  func.func @transform_0(%arg0: i32) -> (i32, i32) {
    %c0_i32 = arith.constant 0 : i32
    %c0_i32_0 = arith.constant 0 : i32
    return %c0_i32, %arg0 : i32, i32
  }
  func.func @transform_1(%arg0: i32) -> (i32, i32) {
    %c0_i32 = arith.constant 0 : i32
    %c0_i32_0 = arith.constant 0 : i32
    %c0_i32_1 = arith.constant 0 : i32
    return %c0_i32, %c0_i32_0 : i32, i32
  }
  func.func @transform_2(%arg0: i32) -> (i32, i32) {
    %c0_i32 = arith.constant 0 : i32
    %c0_i32_0 = arith.constant 0 : i32
    %c0_i32_1 = arith.constant 0 : i32
    return %c0_i32, %c0_i32_0 : i32, i32
  }
  func.func @transform_3(%arg0: i32) -> (i32, i32) {
    %c0_i32 = arith.constant 0 : i32
    %c0_i32_0 = arith.constant 0 : i32
    %c0_i32_1 = arith.constant 0 : i32
    return %c0_i32, %c0_i32_0 : i32, i32
  }
  func.func @transform_4(%arg0: i32) -> (i32, i32) {
    %c0_i32 = arith.constant 0 : i32
    %c0_i32_0 = arith.constant 0 : i32
    %c0_i32_1 = arith.constant 0 : i32
    return %c0_i32, %c0_i32_0 : i32, i32
  }
  func.func @transform_5(%arg0: i32) -> (i32, i32) {
    %c0_i32 = arith.constant 0 : i32
    %c0_i32_0 = arith.constant 0 : i32
    return %c0_i32, %arg0 : i32, i32
  }
}

</mosaic_0001>

<bundles_post_ra>
// kernel: tpu_custom_call.1
= control target key start
LH: loop header
LB: loop body
LE: loop exit
PB: predicated region body
PF: predicated region fallthrough
CT: control target
= control target key end

     0   :  { %vm37_vm0 = vcmask 64512   ;;  %v204_v4 = vmov 0   ;;  %s272_s0 = inlined_call_operand.vmem [shape: f32[8,128], index: 0, kind: input, shape index: {}]   ;;  %s273_s1 = inlined_call_operand.vmem [shape: f32[10,8], index: 1, kind: input, shape index: {}]   ;;  %s274_s2 = inlined_call_operand.vmem [shape: f32[10,1], index: 2, kind: input, shape index: {}]   ;;  %s275_s3 = inlined_call_operand.vmem [shape: f32[10,1], index: 3, kind: input, shape index: {}]   ;;  %s276_s4 = inlined_call_operand.<no memory space> [shape: f32[1,1], index: 4, kind: input, shape index: {}]   ;;  %s277_s5 = inlined_call_operand.hbm [shape: f32[1,128], index: 5, kind: output, shape index: {}]  }
   0x1   :  { %v22_v0 = vld [vmem:[%s272_s0] sm:$0xff]  ;;  %v24_v2 = vld [vmem:[%s273_s1 + $0x8] sm:$0x3]  ;;  %174 = vset.pattern.permute.xlu0 %v204_v4 }
   0x2   :  { %v23_v1 = vld [vmem:[%s273_s1] sm:$0xff]  ;;  %167 = vmatprep.subr.mxu0 %v22_v0  ;;  %v26_v3 = vld [vmem:[%s274_s2 + $0x8] sm:$0x3] }
   0x3   :  { %169 = vmatprep.mubr.msk.f32.mxu0 %vm37_vm0, %v23_v1  ;;  %168 = vmatpush3.msra.mxu0 %v22_v0  ;;  %v122_v5 = vld [vmem:[%s275_s3 + $0x8] sm:$0x3] }
   0x4   :  { %11 = vsyncpa [#allocation4], 0  ;;  %170 = vmatmul.mubr.msk.f32.vlgmr.msra.gmra.mrb[0].mxu0 %vm37_vm0, %v24_v2  ;;  %34 = vperm.xlu0 %174, %v26_v3   ;;  %v25_v6 = vld [vmem:[%s274_s2] sm:$0xff]  ;;  %vm135_vm1 = vcmask 1041408   ;;  %v145_v27 = vstv %s276_s4  ;;  %s205_s30 = smov [#allocation3]  }
   0x5   :  { %175 = vset.pattern.permute.xlu1 %v204_v4  ;;  %v121_v7 = vld [vmem:[%s275_s3] sm:$0xff]  ;;  %s154_s6 = sshll.u32 %s205_s30, 4  ;;  %s155_s6 = int_to_ptr.vmem [resolvable:$true] %s154_s6 }
   0x6   :  { %130 = vperm.xlu1 %175, %v122_v5   ;;  %s180_s7 = scalar_lea.vmem %s155_s6, 16  ;;  %s184_s8 = scalar_lea.vmem %s155_s6, 32 }
   0x7   :  { %p181_p0 = scmp.ne.s32.totalorder %s155_s6, %s180_s7  ;;  %p185_p1 = scmp.lt.s32.totalorder %s155_s6, %s155_s6 }
   0x8   :  { %29 = vperm.xlu0 %174, %v25_v6   ;;  %p186_p2 = scmp.lt.s32.totalorder %s184_s8, %s180_s7 }
   0xa   :  { %125 = vperm.xlu1 %175, %v121_v7   ;;  %p187_p3 = por %p186_p2, %p185_p1 }
   0xc   :  { %p188_p4 = pnand %p187_p3, %p181_p0 }
  0x83   :  { %v35_v8 = vpop.permute.xlu0 %34 }
  0x85   :  { %v131_v14 = vpop.permute.xlu1 %130 }
  0x87   :  { %v30_v10 = vpop.permute.xlu0 %29 }
  0x89   :  { %v126_v18 = vpop.permute.xlu1 %125 }
  0xd7   :  { %v171_v9 = vpop.f32.mrb[0].mxu0 }
  0xd8   :  { %v116_v11 = vadd.f32 %v171_v9, %v35_v8  ;;  %v110_v12 = vpop.f32.mrb[1].mxu0 }
  0xd9   :  { %v111_v13 = vadd.f32 %v110_v12, %v30_v10 }
  0xda   :  { %176 = vtanh.f32 %v116_v11 }
  0xdb   :  { %178 = vtanh.f32 %v111_v13 }
  0xe4   :  { %v177_v15 = vpop.eup %176 }
  0xe5   :  { %v179_v16 = vpop.eup %178  ;;  %v134_v17 = vmul.f32 %v177_v15, %v131_v14 }
  0xe6   :  { %v133_v19 = vmul.f32 %v179_v16, %v126_v18 }
  0xe7   :  { %v136_v20 = vsel %vm135_vm1, %v134_v17, 0.0 }
  0xe8   :  { %v137_v21 = vadd.f32 %v136_v20, %v133_v19 }
  0xea   :  { %v138_v22 = vrot.slane %v137_v21, 4 }
  0xec   :  { %v139_v23 = vadd.f32 %v138_v22, %v137_v21 }
  0xee   :  { %v140_v24 = vrot.slane %v139_v23, 2 }
  0xf0   :  { %v141_v25 = vadd.f32 %v140_v24, %v139_v23 }
  0xf2   :  { %v142_v26 = vrot.slane %v141_v25, 1 }
  0xf4   :  { %v143_v28 = vadd.f32 %v142_v26, %v141_v25 }
  0xf6   :  { %v146_v29 = vadd.f32 %v145_v27, %v143_v28 }
  0xf8   :  { %147 = vst [vmem:[#allocation3] sm:$0x1] %v146_v29 }
  0xf9   :  { %191 = shalt.err (!%p188_p4)
}
  0xfa   :  { %s192_s11 = scalar_lea.hbm %s277_s5, 16 }
  0xfb   :  { %p193_p5 = scmp.ne.s32.totalorder %s277_s5, %s192_s11  ;;  %p196_p6 = scmp.lt.u32.totalorder %s192_s11, %s277_s5 }
  0xfd   :  { %p198_p7 = pnand %p196_p6, %p193_p5 }
  0xff   :  { %201 = shalt.err (!%p198_p7)
}
 0x100   :  { %157 = dma.vmem_to_hbm [thread:$0]  %s155_s6, 16, %s277_s5, [#allocation4]  }
 0x101   :  { %202 = dma.done.wait [#allocation4], 16  }
 0x102   :  { %203 = vsyncadd [#allocation4], 4294967280 }
 0x103   :  { %161 = vsyncpa [#allocation4], 1 }

</bundles_post_ra>
